<compile_context>
chip_gen: v7x
topology: tpu7x:2x2x1
jax: 0.10.0
libtpu: 0.0.40
codegen_flags: <defaults>
</compile_context>

<pallas_src>
import math

import jax
import jax.numpy as jnp
from jax.experimental import pallas as pl
from jax.experimental.pallas import tpu as pltpu


def _round_up(x, m):
    return ((x + m - 1) // m) * m


def mlp_kernel(x_ref, w1_ref, b1_ref, w2_ref, b2_ref, w3_ref, b3_ref, o_ref):
    # Fully fused 3-layer MLP for one batch tile; everything lives in VMEM.
    # Accumulation is always f32; activations are cast back to the streamed dtype
    # between layers so bf16 inputs use the bf16 MXU path.
    act_dt = x_ref.dtype
    h1 = jnp.dot(x_ref[...], w1_ref[...], preferred_element_type=jnp.float32)
    h1 = jnp.maximum(h1 + b1_ref[...], 0.0).astype(act_dt)
    h2 = jnp.dot(h1, w2_ref[...], preferred_element_type=jnp.float32)
    h2 = jnp.maximum(h2 + b2_ref[...], 0.0).astype(act_dt)
    out = jnp.dot(h2, w3_ref[...], preferred_element_type=jnp.float32) + b3_ref[...]
    o_ref[...] = out.astype(o_ref.dtype)


def mlp_forward(x, params, *, compute_dtype=None, tm=None):
    """Fused MLP forward.  x: [B, input_size].

    compute_dtype: optional narrower dtype (e.g. jnp.bfloat16) for the HBM-streamed
    input, the resident weights and the output.  Accumulation stays f32.
    """
    w1, b1 = params["w1"], params["b1"]
    w2, b2 = params["w2"], params["b2"]
    w3, b3 = params["w3"], params["b3"]

    B, in_dim = x.shape
    h1_dim = w1.shape[1]
    h2_dim = w2.shape[1]
    out_dim = w3.shape[1]

    # --- lane-pad the narrow hidden layer (32 -> 128): ReLU(0)=0 and zero rows in
    # --- w3 keep results identical, but h2 becomes a full-width vreg. -------------
    h2_pad = _round_up(h2_dim, 128)
    if h2_pad != h2_dim:
        w2 = jnp.zeros((h1_dim, h2_pad), w2.dtype).at[:, :h2_dim].set(w2)
        b2 = jnp.zeros((1, h2_pad), b2.dtype).at[:, :h2_dim].set(b2)
        w3 = jnp.zeros((h2_pad, out_dim), w3.dtype).at[:h2_dim, :].set(w3)

    # --- optional narrow streaming dtype (biases stay f32; accumulation stays f32) --
    if compute_dtype is not None:
        x = x.astype(compute_dtype)
        w1 = w1.astype(compute_dtype)
        w2 = w2.astype(compute_dtype)
        w3 = w3.astype(compute_dtype)
    out_dtype = x.dtype

    # --- per-generation VMEM budget -> batch tile size ------------------------------
    try:
        vmem_total = int(pltpu.get_tpu_info().vmem_capacity_bytes)
    except Exception:
        vmem_total = 64 * 1024 * 1024  # conservative fallback (v7x per-TC)
    budget = int(vmem_total * 0.70)

    x_bpe = jnp.dtype(x.dtype).itemsize
    w_bpe = jnp.dtype(w1.dtype).itemsize
    o_bpe = jnp.dtype(out_dtype).itemsize

    # Resident weights/biases are double-buffered by the default pipeline.
    weight_bytes = 2 * (
        (in_dim * h1_dim + h1_dim * h2_pad + h2_pad * out_dim) * w_bpe
        + (h1_dim + h2_pad + out_dim) * 4
    )
    # Per-row VMEM: double-buffered x tile + out tile, plus f32 intermediates.
    per_row = 2 * in_dim * x_bpe + 2 * out_dim * o_bpe + (h1_dim + h2_pad) * 4

    if tm is None:
        tm_budget = max(16, (budget - weight_bytes) // max(per_row, 1))
        tm = min(1024, tm_budget, _round_up(B, 16))
        tm = max(16, (tm // 16) * 16)
        # v7x megacore: keep >=2 grid steps for large batches so the "parallel"
        # batch axis can shard across both TensorCores.
        if B >= 256 and pl.cdiv(B, tm) < 2:
            tm = max(16, _round_up(pl.cdiv(B, 2), 16))
    tm = max(8, _round_up(int(tm), 8))

    est_bytes = weight_bytes + tm * per_row + (2 << 20)
    vmem_limit = int(min(0.9 * vmem_total, max(est_bytes, 32 * 1024 * 1024)))

    grid = (pl.cdiv(B, tm),)

    def resident(shape):
        # Constant block index -> tensor stays VMEM-resident across the whole grid.
        return pl.BlockSpec(shape, lambda i: tuple(0 for _ in shape))

    out = pl.pallas_call(
        mlp_kernel,
        out_shape=jax.ShapeDtypeStruct((B, out_dim), out_dtype),
        grid_spec=pltpu.PrefetchScalarGridSpec(
            num_scalar_prefetch=0,
            grid=grid,
            in_specs=[
                pl.BlockSpec((tm, in_dim), lambda i: (i, 0)),   # x tile (streamed)
                resident((in_dim, h1_dim)),                     # w1 (resident)
                resident((1, h1_dim)),                          # b1
                resident((h1_dim, h2_pad)),                     # w2 (lane-padded)
                resident((1, h2_pad)),                          # b2 (lane-padded)
                resident((h2_pad, out_dim)),                    # w3 (row-padded)
                resident((1, out_dim)),                         # b3
            ],
            out_specs=pl.BlockSpec((tm, out_dim), lambda i: (i, 0)),
        ),
        compiler_params=pltpu.CompilerParams(
            dimension_semantics=("parallel",),
            vmem_limit_bytes=vmem_limit,
        ),
    )(x, w1, b1, w2, b2, w3, b3)
    return out


def init_linear(key, in_features, out_features):
    """PyTorch-style nn.Linear init (uniform in +/- 1/sqrt(in)).

    Weight is returned already transposed to [in_features, out_features]; bias as
    [1, out_features] for TPU-friendly 2D broadcasting.
    """
    kw, kb = jax.random.split(key)
    bound = 1.0 / math.sqrt(in_features)
    w = jax.random.uniform(kw, (in_features, out_features), jnp.float32,
                           minval=-bound, maxval=bound)
    b = jax.random.uniform(kb, (1, out_features), jnp.float32,
                           minval=-bound, maxval=bound)
    return w, b


def make_params(key, input_size, output_size):
    k1, k2, k3 = jax.random.split(key, 3)
    w1, b1 = init_linear(k1, input_size, 128)
    w2, b2 = init_linear(k2, 128, 32)
    w3, b3 = init_linear(k3, 32, output_size)
    return {"w1": w1, "b1": b1, "w2": w2, "b2": b2, "w3": w3, "b3": b3}


def mlp_reference(x, p):
    h1 = jnp.maximum(x @ p["w1"] + p["b1"], 0.0)
    h2 = jnp.maximum(h1 @ p["w2"] + p["b2"], 0.0)
    return h2 @ p["w3"] + p["b3"]


if __name__ == "__main__":
    input_size = 64
    output_size = 16
    batch = 16

    key = jax.random.PRNGKey(0)
    kx, kp = jax.random.split(key)

    x = jax.random.normal(kx, (batch, input_size), jnp.float32)
    params = make_params(kp, input_size, output_size)

    out = jax.block_until_ready(mlp_forward(x, params))
    ref = mlp_reference(x, params)
    assert out.shape == (batch, output_size), out.shape
    assert jnp.allclose(out, ref, atol=1e-5, rtol=1e-5), "mismatch vs JAX reference"

    # Ragged batch (not a multiple of 8 / the tile): exercises the partial trailing
    # block (OOB reads are row-local garbage, OOB writes are dropped).
    x2 = jax.random.normal(kx, (batch + 3, input_size), jnp.float32)
    out2 = jax.block_until_ready(mlp_forward(x2, params))
    assert out2.shape == (batch + 3, output_size)
    assert jnp.allclose(out2, mlp_reference(x2, params), atol=1e-5, rtol=1e-5)

    # bf16 streaming path (f32 accumulation): halves the x / output HBM streams.
    out_bf16 = jax.block_until_ready(
        mlp_forward(x, params, compute_dtype=jnp.bfloat16))
    assert out_bf16.shape == (batch, output_size)
    assert out_bf16.dtype == jnp.bfloat16
    assert jnp.allclose(out_bf16.astype(jnp.float32), ref, atol=5e-2, rtol=5e-2)

    print("KERNEL_OK")
</pallas_src>

<mosaic_0001>
module attributes {stable_mosaic.version = 11 : i64} {
  func.func @mlp_kernel(%arg0: i32, %arg1: memref<16x64xf32, #tpu.memory_space<vmem>>, %arg2: memref<64x128xf32, #tpu.memory_space<vmem>>, %arg3: memref<1x128xf32, #tpu.memory_space<vmem>>, %arg4: memref<128x128xf32, #tpu.memory_space<vmem>>, %arg5: memref<1x128xf32, #tpu.memory_space<vmem>>, %arg6: memref<128x16xf32, #tpu.memory_space<vmem>>, %arg7: memref<1x16xf32, #tpu.memory_space<vmem>>, %arg8: memref<16x16xf32, #tpu.memory_space<vmem>>) attributes {dimension_semantics = [#tpu.dimension_semantics<parallel>], iteration_bounds = array<i64: 1>, scalar_prefetch = 0 : i64, scratch_operands = 0 : i64, tpu.core_type = #tpu.core_type<tc>, window_params = [{transform_indices = @transform_0, window_bounds = array<i64: 16, 64>}, {pipeline_mode = #tpu.pipeline_mode<synchronous>, transform_indices = @transform_1, window_bounds = array<i64: 64, 128>}, {pipeline_mode = #tpu.pipeline_mode<synchronous>, transform_indices = @transform_2, window_bounds = array<i64: 1, 128>}, {pipeline_mode = #tpu.pipeline_mode<synchronous>, transform_indices = @transform_3, window_bounds = array<i64: 128, 128>}, {pipeline_mode = #tpu.pipeline_mode<synchronous>, transform_indices = @transform_4, window_bounds = array<i64: 1, 128>}, {pipeline_mode = #tpu.pipeline_mode<synchronous>, transform_indices = @transform_5, window_bounds = array<i64: 128, 16>}, {pipeline_mode = #tpu.pipeline_mode<synchronous>, transform_indices = @transform_6, window_bounds = array<i64: 1, 16>}, {transform_indices = @transform_7, window_bounds = array<i64: 16, 16>}]} {
    %c0 = arith.constant 0 : index
    %c0_0 = arith.constant 0 : index
    %0 = vector.load %arg1[%c0, %c0_0] : memref<16x64xf32, #tpu.memory_space<vmem>>, vector<16x64xf32>
    %c0_1 = arith.constant 0 : index
    %c0_2 = arith.constant 0 : index
    %1 = vector.load %arg2[%c0_1, %c0_2] : memref<64x128xf32, #tpu.memory_space<vmem>>, vector<64x128xf32>
    %cst = arith.constant dense<0.000000e+00> : vector<16x128xf32>
    %2 = tpu.matmul %0, %1, %cst {dimension_numbers = #tpu.dot_dimension_numbers<[1], [0], [0], [1], [0, 0, 1, 1], [], []>} : vector<16x64xf32>, vector<64x128xf32>, vector<16x128xf32> -> vector<16x128xf32>
    %c0_3 = arith.constant 0 : index
    %c0_4 = arith.constant 0 : index
    %3 = vector.load %arg3[%c0_3, %c0_4] : memref<1x128xf32, #tpu.memory_space<vmem>>, vector<1x128xf32>
    %4 = vector.broadcast %3 : vector<1x128xf32> to vector<16x128xf32>
    %5 = arith.addf %2, %4 : vector<16x128xf32>
    %cst_5 = arith.constant 0.000000e+00 : f32
    %6 = vector.broadcast %cst_5 : f32 to vector<16x128xf32>
    %7 = arith.maximumf %5, %6 : vector<16x128xf32>
    %c0_6 = arith.constant 0 : index
    %c0_7 = arith.constant 0 : index
    %8 = vector.load %arg4[%c0_6, %c0_7] : memref<128x128xf32, #tpu.memory_space<vmem>>, vector<128x128xf32>
    %cst_8 = arith.constant dense<0.000000e+00> : vector<16x128xf32>
    %9 = tpu.matmul %7, %8, %cst_8 {dimension_numbers = #tpu.dot_dimension_numbers<[1], [0], [0], [1], [0, 0, 1, 1], [], []>} : vector<16x128xf32>, vector<128x128xf32>, vector<16x128xf32> -> vector<16x128xf32>
    %c0_9 = arith.constant 0 : index
    %c0_10 = arith.constant 0 : index
    %10 = vector.load %arg5[%c0_9, %c0_10] : memref<1x128xf32, #tpu.memory_space<vmem>>, vector<1x128xf32>
    %11 = vector.broadcast %10 : vector<1x128xf32> to vector<16x128xf32>
    %12 = arith.addf %9, %11 : vector<16x128xf32>
    %cst_11 = arith.constant 0.000000e+00 : f32
    %13 = vector.broadcast %cst_11 : f32 to vector<16x128xf32>
    %14 = arith.maximumf %12, %13 : vector<16x128xf32>
    %c0_12 = arith.constant 0 : index
    %c0_13 = arith.constant 0 : index
    %15 = vector.load %arg6[%c0_12, %c0_13] : memref<128x16xf32, #tpu.memory_space<vmem>>, vector<128x16xf32>
    %cst_14 = arith.constant dense<0.000000e+00> : vector<16x16xf32>
    %16 = tpu.matmul %14, %15, %cst_14 {dimension_numbers = #tpu.dot_dimension_numbers<[1], [0], [0], [1], [0, 0, 1, 1], [], []>} : vector<16x128xf32>, vector<128x16xf32>, vector<16x16xf32> -> vector<16x16xf32>
    %c0_15 = arith.constant 0 : index
    %c0_16 = arith.constant 0 : index
    %17 = vector.load %arg7[%c0_15, %c0_16] : memref<1x16xf32, #tpu.memory_space<vmem>>, vector<1x16xf32>
    %18 = vector.broadcast %17 : vector<1x16xf32> to vector<16x16xf32>
    %19 = arith.addf %16, %18 : vector<16x16xf32>
    %c0_17 = arith.constant 0 : index
    %c0_18 = arith.constant 0 : index
    %20 = vector.load %arg8[%c0_17, %c0_18] : memref<16x16xf32, #tpu.memory_space<vmem>>, vector<16x16xf32>
    tpu.vector_store %arg8[%c0_17, %c0_18], %19 {strides = array<i32>} : memref<16x16xf32, #tpu.memory_space<vmem>>, vector<16x16xf32>,
    return
  }
  func.func @transform_0(%arg0: i32) -> (i32, i32) {
    %c0_i32 = arith.constant 0 : i32
    %c0_i32_0 = arith.constant 0 : i32
    return %arg0, %c0_i32 : i32, i32
  }
  func.func @transform_1(%arg0: i32) -> (i32, i32) {
    %c0_i32 = arith.constant 0 : i32
    %c0_i32_0 = arith.constant 0 : i32
    %c0_i32_1 = arith.constant 0 : i32
    return %c0_i32, %c0_i32_0 : i32, i32
  }
  func.func @transform_2(%arg0: i32) -> (i32, i32) {
    %c0_i32 = arith.constant 0 : i32
    %c0_i32_0 = arith.constant 0 : i32
    %c0_i32_1 = arith.constant 0 : i32
    return %c0_i32, %c0_i32_0 : i32, i32
  }
  func.func @transform_3(%arg0: i32) -> (i32, i32) {
    %c0_i32 = arith.constant 0 : i32
    %c0_i32_0 = arith.constant 0 : i32
    %c0_i32_1 = arith.constant 0 : i32
    return %c0_i32, %c0_i32_0 : i32, i32
  }
  func.func @transform_4(%arg0: i32) -> (i32, i32) {
    %c0_i32 = arith.constant 0 : i32
    %c0_i32_0 = arith.constant 0 : i32
    %c0_i32_1 = arith.constant 0 : i32
    return %c0_i32, %c0_i32_0 : i32, i32
  }
  func.func @transform_5(%arg0: i32) -> (i32, i32) {
    %c0_i32 = arith.constant 0 : i32
    %c0_i32_0 = arith.constant 0 : i32
    %c0_i32_1 = arith.constant 0 : i32
    return %c0_i32, %c0_i32_0 : i32, i32
  }
  func.func @transform_6(%arg0: i32) -> (i32, i32) {
    %c0_i32 = arith.constant 0 : i32
    %c0_i32_0 = arith.constant 0 : i32
    %c0_i32_1 = arith.constant 0 : i32
    return %c0_i32, %c0_i32_0 : i32, i32
  }
  func.func @transform_7(%arg0: i32) -> (i32, i32) {
    %c0_i32 = arith.constant 0 : i32
    %c0_i32_0 = arith.constant 0 : i32
    return %arg0, %c0_i32 : i32, i32
  }
}

</mosaic_0001>

<bundles_post_ra>
// kernel: tpu_custom_call.1
= control target key start
LH: loop header
LB: loop body
LE: loop exit
PB: predicated region body
PF: predicated region fallthrough
CT: control target
= control target key end

     0   :  { %12 = vsyncpa [#allocation3], 0  ;;  %s819_s0 = inlined_call_operand.vmem [shape: f32[16,64], index: 0, kind: input, shape index: {}]   ;;  %s820_s1 = inlined_call_operand.hbm [shape: f32[64,128], index: 1, kind: input, shape index: {}]   ;;  %s821_s2 = inlined_call_operand.vmem [shape: f32[1,128], index: 2, kind: input, shape index: {}]   ;;  %s822_s3 = inlined_call_operand.vmem [shape: f32[128,128], index: 3, kind: input, shape index: {}]   ;;  %s823_s4 = inlined_call_operand.vmem [shape: f32[1,128], index: 4, kind: input, shape index: {}]   ;;  %s824_s5 = inlined_call_operand.vmem [shape: f32[128,16], index: 5, kind: input, shape index: {}]   ;;  %s825_s6 = inlined_call_operand.vmem [shape: f32[1,16], index: 6, kind: input, shape index: {}]   ;;  %s826_s7 = inlined_call_operand.hbm [shape: f32[16,16], index: 7, kind: output, shape index: {}]  }
   0x1   :  { %13 = vsyncpa [#allocation4], 0  ;;  %s632_s24 = smov [#allocation2]   ;;  %s584_s28 = scalar_lea.hbm %s820_s1, 1024 }
   0x2   :  { %s21_s25 = sshll.u32 %s632_s24, 4  ;;  %p585_p0 = scmp.ne.s32.totalorder %s820_s1, %s584_s28  ;;  %s22_s25 = int_to_ptr.vmem [resolvable:$true] %s21_s25 }
   0x3   :  { %p588_p1 = scmp.lt.u32.totalorder %s584_s28, %s820_s1 }
   0x5   :  { %p590_p2 = pnand %p588_p1, %p585_p0 }
   0x7   :  { %593 = shalt.err (!%p590_p2)
}
   0x8   :  { %s594_s10 = scalar_lea.vmem %s22_s25, 1024  ;;  %p599_p4 = scmp.lt.s32.totalorder %s22_s25, %s22_s25 }
   0x9   :  { %p595_p3 = scmp.ne.s32.totalorder %s22_s25, %s594_s10  ;;  %p600_p5 = scmp.lt.s32.totalorder %s594_s10, %s594_s10 }
   0xb   :  { %p601_p6 = por %p600_p5, %p599_p4 }
   0xd   :  { %p602_p7 = pnand %p601_p6, %p595_p3 }
   0xf   :  { %605 = shalt.err (!%p602_p7)
}
  0x10   :  { %s633_s11 = smov 128   ;;  %s634_s12 = smov 8  }
  0x11   :  { %27 = dma.hbm_to_vmem [thread:$0]  %s820_s1, 1024, %s22_s25, [#allocation3], %s633_s11, %s633_s11, %s634_s12  }
  0x12   :  { %628 = dma.done.wait [#allocation3], 1024  }
  0x13   :  { %629 = vsyncadd [#allocation3], 4294966272  ;;  %v43_v0 = vld [vmem:[#allocation2] sm:$0xff]  ;;  %v44_v1 = vld [vmem:[#allocation2 + $0x8] sm:$0xff]  ;;  %vm58_vm0 = vcmask 523264   ;;  %vm340_vm1 = vcmask 130048  }
  0x14   :  { %v45_v2 = vld [vmem:[#allocation2 + $0x10] sm:$0xff]  ;;  %v500_v3 = vpack.c.bf16 %v44_v1, %v43_v0  ;;  %v46_v4 = vld [vmem:[#allocation2 + $0x18] sm:$0xff]  ;;  %v47_v6 = vld [vmem:[#allocation2 + $0x20] sm:$0xff] }
  0x15   :  { %v504_v5 = vpack.c.bf16 %v46_v4, %v45_v2  ;;  %v48_v7 = vld [vmem:[#allocation2 + $0x28] sm:$0xff]  ;;  %v41_v8 = vld [vmem:[%s819_s0] sm:$0xff]  ;;  %v144_v12 = vld [vmem:[%s822_s3 + $0x10] sm:$0xff] }
  0x16   :  { %501 = vmatprep.subr.bf16.mxu0 %v500_v3  ;;  %427 = vmatprep.mubr.msk.f32.mxu0 %vm58_vm0, %v41_v8  ;;  %v142_v9 = vld [vmem:[%s822_s3] sm:$0xff]  ;;  %v143_v10 = vld [vmem:[%s822_s3 + $0x8] sm:$0xff]  ;;  %v145_v13 = vld [vmem:[%s822_s3 + $0x18] sm:$0xff]  ;;  %v508_v14 = vpack.c.bf16 %v48_v7, %v47_v6 }
  0x17   :  { %503 = vmatpush3.bf16.msra.mxu0 %v500_v3  ;;  %v516_v11 = vpack.c.bf16 %v143_v10, %v142_v9  ;;  %v520_v15 = vpack.c.bf16 %v145_v13, %v144_v12  ;;  %v146_v16 = vld [vmem:[%s822_s3 + $0x20] sm:$0xff]  ;;  %v147_v17 = vld [vmem:[%s822_s3 + $0x28] sm:$0xff]  ;;  %v49_v18 = vld [vmem:[#allocation2 + $0x30] sm:$0xff] }
  0x18   :  { %505 = vmatprep.subr.bf16.mxu0 %v504_v5  ;;  %v50_v19 = vld [vmem:[#allocation2 + $0x38] sm:$0xff]  ;;  %v524_v20 = vpack.c.bf16 %v147_v17, %v146_v16  ;;  %v148_v22 = vld [vmem:[%s822_s3 + $0x30] sm:$0xff]  ;;  %v150_v25 = vld [vmem:[%s822_s3 + $0x40] sm:$0xff] }
  0x19   :  { %517 = vmatprep.subr.bf16.mxu1 %v516_v11  ;;  %v512_v21 = vpack.c.bf16 %v50_v19, %v49_v18  ;;  %v149_v23 = vld [vmem:[%s822_s3 + $0x38] sm:$0xff]  ;;  %v151_v26 = vld [vmem:[%s822_s3 + $0x48] sm:$0xff]  ;;  %v152_v29 = vld [vmem:[%s822_s3 + $0x50] sm:$0xff] }
  0x1a   :  { %519 = vmatpush3.bf16.msra.mxu1 %v516_v11  ;;  %v528_v24 = vpack.c.bf16 %v149_v23, %v148_v22  ;;  %v42_v27 = vld [vmem:[%s819_s0 + $0x8] sm:$0xff]  ;;  %v532_v28 = vpack.c.bf16 %v151_v26, %v150_v25  ;;  %v153_v30 = vld [vmem:[%s822_s3 + $0x58] sm:$0xff]  ;;  %v154_v32 = vld [vmem:[%s822_s3 + $0x60] sm:$0xff] }
  0x1b   :  { %507 = vmatpush3.bf16.msra.mxu0 %v504_v5  ;;  %521 = vmatprep.subr.bf16.mxu1 %v520_v15  ;;  %v536_v31 = vpack.c.bf16 %v153_v30, %v152_v29  ;;  %v155_v33 = vld [vmem:[%s822_s3 + $0x68] sm:$0xff]  ;;  %v156_v35 = vld [vmem:[%s822_s3 + $0x70] sm:$0xff]  ;;  %v157_v36 = vld [vmem:[%s822_s3 + $0x78] sm:$0xff] }
  0x1c   :  { %509 = vmatprep.subr.bf16.mxu0 %v508_v14  ;;  %v540_v34 = vpack.c.bf16 %v155_v33, %v154_v32  ;;  %v544_v37 = vpack.c.bf16 %v157_v36, %v156_v35  ;;  %v242_v38 = vld [vmem:[%s824_s5] sm:$0xff]  ;;  %v243_v39 = vld [vmem:[%s824_s5 + $0x8] sm:$0xff]  ;;  %v244_v40 = vld [vmem:[%s824_s5 + $0x10] sm:$0xff] }
  0x1d   :  { %v548_v41 = vpack.c.bf16 %v243_v39, %v242_v38  ;;  %v245_v42 = vld [vmem:[%s824_s5 + $0x18] sm:$0xff]  ;;  %v246_v44 = vld [vmem:[%s824_s5 + $0x20] sm:$0xff]  ;;  %v247_v45 = vld [vmem:[%s824_s5 + $0x28] sm:$0xff] }
  0x1e   :  { %523 = vmatpush3.bf16.msra.mxu1 %v520_v15  ;;  %v552_v43 = vpack.c.bf16 %v245_v42, %v244_v40  ;;  %v556_v46 = vpack.c.bf16 %v247_v45, %v246_v44  ;;  %v248_v47 = vld [vmem:[%s824_s5 + $0x30] sm:$0xff]  ;;  %v249_v48 = vld [vmem:[%s824_s5 + $0x38] sm:$0xff]  ;;  %v250_v50 = vld [vmem:[%s824_s5 + $0x40] sm:$0xff] }
  0x1f   :  { %511 = vmatpush3.bf16.msra.mxu0 %v508_v14  ;;  %525 = vmatprep.subr.bf16.mxu1 %v524_v20  ;;  %v560_v49 = vpack.c.bf16 %v249_v48, %v248_v47  ;;  %v251_v51 = vld [vmem:[%s824_s5 + $0x48] sm:$0xff]  ;;  %v252_v53 = vld [vmem:[%s824_s5 + $0x50] sm:$0xff]  ;;  %v253_v54 = vld [vmem:[%s824_s5 + $0x58] sm:$0xff] }
  0x20   :  { %513 = vmatprep.subr.bf16.mxu0 %v512_v21  ;;  %v564_v52 = vpack.c.bf16 %v251_v51, %v250_v50  ;;  %v568_v55 = vpack.c.bf16 %v253_v54, %v252_v53  ;;  %v254_v56 = vld [vmem:[%s824_s5 + $0x60] sm:$0xff]  ;;  %v255_v57 = vld [vmem:[%s824_s5 + $0x68] sm:$0xff]  ;;  %v256_v2 = vld [vmem:[%s824_s5 + $0x70] sm:$0xff] }
  0x21   :  { %v572_v58 = vpack.c.bf16 %v255_v57, %v254_v56  ;;  %v360_v59 = vld [vmem:[%s821_s2] ss:$0 sm:$0xff]  ;;  %v257_v3 = vld [vmem:[%s824_s5 + $0x78] sm:$0xff]  ;;  %s635_s5 = smov [#allocation5]  }
  0x22   :  { %527 = vmatpush3.bf16.msra.mxu1 %v524_v20  ;;  %v576_v4 = vpack.c.bf16 %v257_v3, %v256_v2  ;;  %v363_v5 = vld [vmem:[%s823_s4] ss:$0 sm:$0xff]  ;;  %s348_s1 = sshll.u32 %s635_s5, 4  ;;  %s349_s1 = int_to_ptr.vmem [resolvable:$true] %s348_s1 }
  0x23   :  { %515 = vmatpush3.bf16.msra.mxu0 %v512_v21  ;;  %529 = vmatprep.subr.bf16.mxu1 %v528_v24  ;;  %v364_v12 = vld [vmem:[%s825_s6] ss:$0 sm:$0xff]  ;;  %s606_s4 = scalar_lea.vmem %s349_s1, 256  ;;  %p611_p9 = scmp.lt.s32.totalorder %s349_s1, %s349_s1 }
  0x24   :  { %549 = vmatprep.subr.bf16.mxu0 %v548_v41  ;;  %p607_p8 = scmp.ne.s32.totalorder %s349_s1, %s606_s4  ;;  %p612_p10 = scmp.lt.s32.totalorder %s606_s4, %s606_s4 }
  0x26   :  { %428 = vmatmul.mubr.msk.f32.vlgmr.msra.gmra.mrb[0].mxu0 %vm58_vm0, %v42_v27  ;;  %531 = vmatpush3.bf16.msra.mxu1 %v528_v24  ;;  %p613_p11 = por %p612_p10, %p611_p9 }
  0x27   :  { %533 = vmatprep.subr.bf16.mxu1 %v532_v28  ;;  %551 = vmatpush3.bf16.msra.mxu0 %v548_v41 }
  0x28   :  { %553 = vmatprep.subr.bf16.mxu0 %v552_v43  ;;  %p614_p12 = pnand %p613_p11, %p607_p8 }
  0x2a   :  { %535 = vmatpush3.bf16.msra.mxu1 %v532_v28 }
  0x2b   :  { %537 = vmatprep.subr.bf16.mxu1 %v536_v31  ;;  %555 = vmatpush3.bf16.msra.mxu0 %v552_v43 }
  0x2c   :  { %557 = vmatprep.subr.bf16.mxu0 %v556_v46 }
  0x2e   :  { %539 = vmatpush3.bf16.msra.mxu1 %v536_v31 }
  0x2f   :  { %541 = vmatprep.subr.bf16.mxu1 %v540_v34  ;;  %559 = vmatpush3.bf16.msra.mxu0 %v556_v46 }
  0x30   :  { %561 = vmatprep.subr.bf16.mxu0 %v560_v49 }
  0x32   :  { %543 = vmatpush3.bf16.msra.mxu1 %v540_v34 }
  0x33   :  { %545 = vmatprep.subr.bf16.mxu1 %v544_v37  ;;  %563 = vmatpush3.bf16.msra.mxu0 %v560_v49 }
  0x34   :  { %565 = vmatprep.subr.bf16.mxu0 %v564_v52 }
  0x36   :  { %547 = vmatpush3.bf16.msra.mxu1 %v544_v37 }
  0x37   :  { %567 = vmatpush3.bf16.msra.mxu0 %v564_v52 }
  0x38   :  { %569 = vmatprep.subr.bf16.mxu0 %v568_v55 }
  0x3b   :  { %571 = vmatpush3.bf16.msra.mxu0 %v568_v55 }
  0x3c   :  { %573 = vmatprep.subr.bf16.mxu0 %v572_v58 }
  0x3f   :  { %575 = vmatpush3.bf16.msra.mxu0 %v572_v58 }
  0x40   :  { %577 = vmatprep.subr.bf16.mxu0 %v576_v4 }
  0x43   :  { %579 = vmatpush3.bf16.msra.mxu0 %v576_v4 }
  0xf9   :  { %v429_v60 = vpop.f32.mrb[0].mxu0 }
  0xfa   :  { %v137_v61 = vadd.f32 %v429_v60, %v360_v59  ;;  %v131_v62 = vpop.f32.mrb[1].mxu0 }
  0xfb   :  { %v132_v63 = vadd.f32 %v360_v59, %v131_v62 }
  0xfc   :  { %v141_v1 = vmax.f32 %v137_v61, 0.0 }
  0xfd   :  { %v140_v0 = vmax.f32 %v132_v63, 0.0 }
  0xff   :  { %462 = vmatprep.mubr.f32.mxu1 %v140_v0 }
 0x100   :  { %463 = vmatmul.mubr.f32.vlgmr.msra.gmra.mrb[0].mxu1 %v141_v1 }
 0x1d3   :  { %v464_v6 = vpop.f32.mrb[0].mxu1 }
 0x1d4   :  { %v237_v7 = vadd.f32 %v464_v6, %v363_v5  ;;  %v231_v8 = vpop.f32.mrb[1].mxu1 }
 0x1d5   :  { %v232_v9 = vadd.f32 %v363_v5, %v231_v8 }
 0x1d6   :  { %v241_v11 = vmax.f32 %v237_v7, 0.0 }
 0x1d7   :  { %v240_v10 = vmax.f32 %v232_v9, 0.0 }
 0x1d9   :  { %497 = vmatprep.mubr.f32.mxu0 %v240_v10 }
 0x1da   :  { %498 = vmatmul.mubr.f32.vlgmr.msra.gmra.mrb[2].mxu0 %v241_v11 }
 0x2ad   :  { %v499_v13 = vpop.f32.mrb[2].mxu0 }
 0x2ae   :  { %v337_v14 = vadd.f32 %v499_v13, %v364_v12  ;;  %v331_v15 = vpop.f32.mrb[3].mxu0 }
 0x2af   :  { %v332_v16 = vadd.f32 %v364_v12, %v331_v15 }
 0x2b0   :  { %342 = vst.msk [vmem:[#allocation5 + $0x8] sm:$0xff] %vm340_vm1, %v337_v14 }
 0x2b1   :  { %341 = vst.msk [vmem:[#allocation5] sm:$0xff] %vm340_vm1, %v332_v16 }
 0x2b2   :  { %617 = shalt.err (!%p614_p12)
}
 0x2b3   :  { %s618_s6 = scalar_lea.hbm %s826_s7, 256 }
 0x2b4   :  { %p619_p13 = scmp.ne.s32.totalorder %s826_s7, %s618_s6  ;;  %p622_p0 = scmp.lt.u32.totalorder %s618_s6, %s826_s7 }
 0x2b6   :  { %p624_p1 = pnand %p622_p0, %p619_p13 }
 0x2b8   :  { %627 = shalt.err (!%p624_p1)
}
 0x2b9   :  { %354 = dma.vmem_to_hbm [thread:$0]  %s349_s1, 256, %s826_s7, [#allocation4], %s633_s11, %s633_s11, %s634_s12  }
 0x2ba   :  { %630 = dma.done.wait [#allocation4], 256  }
 0x2bb   :  { %631 = vsyncadd [#allocation4], 4294967040 }
 0x2bc   :  { %358 = vsyncpa [#allocation3], 1 }
 0x2bd   :  { %359 = vsyncpa [#allocation4], 1 }

</bundles_post_ra>
